<compile_context>
chip_gen: v7x
topology: tpu7x:2x2x1
jax: 0.10.0
libtpu: 0.0.40
codegen_flags: <defaults>
</compile_context>

<pallas_src>
import jax
import jax.numpy as jnp
from jax.experimental import pallas as pl
from jax.experimental.pallas import tpu as pltpu

# ----------------- small, ExplaiNN-consistent configuration ------------------
B = 2            # batch
L = 50           # input_length
U = 8            # num_cnns
K = 19           # filter_size
POOL = 7         # pool_size
STRIDE = 7       # pool_stride
H = 100          # hidden units per CNN unit (num_fc == 2 branch)
C = 3            # num_classes
T = L - (K - 1)                      # conv output length  = 32
P = (T - POOL) // STRIDE + 1         # max-pooled length   = 4
EPS = 1e-5
CPAD = 128                           # lane-dense padded class dimension

assert POOL == STRIDE, "window max-pool below assumes pool_size == pool_stride"


def _pick_bt(batch, cap=1024):
    # Largest divisor of `batch` <= cap.  cap ~1024-1536 on v7x (64 MiB VMEM),
    # ~2048-4096 on v5e/v6e (128 MiB).  When BT < batch it should be a
    # multiple of 8 (output block rule) and batch//BT >= 2 so both v7x
    # TensorCores get work; at the toy size BT == batch (grid=(1,)).
    bt = min(batch, cap)
    while batch % bt:
        bt -= 1
    return bt


BT = _pick_bt(B)                     # = B = 2 here -> grid=(1,)
assert B % BT == 0


# ------------------------------- Pallas kernel -------------------------------
def _explainn_kernel(x_ref, wcol_ref, b0_ref, w1_ref, b1_ref,
                     w2_ref, b2_ref, wf_ref, bf_ref, out_ref):
    f32 = jnp.float32

    # Grouped Conv1d(4*U -> U, kernel=K, groups=U) on the channel-repeated
    # input == one im2col matmul: every group sees the same 4 input channels,
    # so the (BT*T, 4*K) patch matrix hits a shared (4*K, U) weight matrix.
    # BN0 scale is folded into wcol; conv bias + BN0 shift live in b0.
    xc = x_ref[...].reshape(BT * T, 4 * K)                          # (BT*T, 76)
    conv = jnp.dot(xc, wcol_ref[...], preferred_element_type=f32) + b0_ref[...]
    act = jnp.exp(conv).reshape(BT, T, U)                           # ExpActivation

    # MaxPool1d(POOL, STRIDE): static sublane windows + max-reduce, emitted
    # directly in the flattened (p*U + u) column order needed by FC1.
    # Trailing T - P*STRIDE positions are dropped (floor semantics).
    pooled = jnp.concatenate(
        [jnp.max(act[:, p * POOL:(p + 1) * POOL, :], axis=1) for p in range(P)],
        axis=-1)                                                    # (BT, P*U)

    # per-unit FC1 (grouped 1x1 conv: P -> H) as ONE dense matmul against a
    # block-diagonal (P*U, U*H) weight (BN1 scale folded in); lane-dense 800-
    # wide output.  Dropout(0.3) is an eval-mode identity.
    h = jnp.dot(pooled, w1_ref[...], preferred_element_type=f32) + b1_ref[...]
    h = jnp.maximum(h, 0.0)                                         # (BT, U*H)

    # per-unit FC2 (grouped 1x1 conv: H -> 1) as one dense matmul against a
    # block-structured (U*H, U) weight (BN2 scale folded in) + ReLU.
    o2 = jnp.dot(h, w2_ref[...], preferred_element_type=f32) + b2_ref[...]
    o2 = jnp.maximum(o2, 0.0)                                       # (BT, U)

    # final Linear(U -> C), padded to 128 lanes for an unmasked store.
    out = jnp.dot(o2, wf_ref[...], preferred_element_type=f32) + bf_ref[...]
    out_ref[...] = out.astype(out_ref.dtype)                        # (BT, CPAD)


# --------------------------------- wrapper ------------------------------------
def _im2col(x_nlc):
    # (B, L, 4) -> (B, T, K*4); column index = k*4 + c (matches wcol layout).
    idx = jnp.arange(T)[:, None] + jnp.arange(K)[None, :]           # (T, K)
    return x_nlc[:, idx, :].reshape(B, T, K * 4)


@jax.jit
def explainn_forward(x_ncl, kp):
    x_nlc = jnp.transpose(x_ncl, (0, 2, 1)).astype(jnp.float32)     # (B, L, 4)
    x_col = _im2col(x_nlc)                                          # (B, T, 76)

    def const(r, c):            # resident weight: same block for every step
        return pl.BlockSpec((r, c), lambda i: (0, 0))

    in_specs = [
        pl.BlockSpec((BT, T, 4 * K), lambda i: (i, 0, 0)),          # x_col
        const(4 * K, U),                                            # wcol (BN0-scaled)
        const(1, U),                                                # b0
        const(P * U, U * H),                                        # w1 block-diag
        const(1, U * H),                                            # b1
        const(U * H, U),                                            # w2 block-struct
        const(1, U),                                                # b2
        const(U, CPAD),                                             # wf (padded)
        const(1, CPAD),                                             # bf (padded)
    ]
    out = pl.pallas_call(
        _explainn_kernel,
        out_shape=jax.ShapeDtypeStruct((B, CPAD), jnp.float32),
        grid_spec=pltpu.PrefetchScalarGridSpec(
            num_scalar_prefetch=0,
            grid=(B // BT,),
            in_specs=in_specs,
            out_specs=pl.BlockSpec((BT, CPAD), lambda i: (i, 0)),
        ),
        compiler_params=pltpu.CompilerParams(
            dimension_semantics=("parallel",),
            # Tiny here; raise when BT is scaled (budget against 64 MiB
            # physical VMEM on v7x, 128 MiB on v5e/v6e).
            vmem_limit_bytes=32 * 1024 * 1024,
        ),
    )(x_col,
      kp["wcol"], kp["b0"], kp["w1bd"], kp["b1"],
      kp["w2bd"], kp["b2"], kp["wf"], kp["bf"])
    return out[:, :C]                                               # (B, C)


# ------------------------ parameters (deterministic) --------------------------
def fold_bn(gamma, beta, mean, var):
    scale = gamma / jnp.sqrt(var + EPS)
    return scale, beta - mean * scale


def init_raw_params(key):
    ks = jax.random.split(key, 20)
    n = lambda k, shp, s=0.1: s * jax.random.normal(k, shp, jnp.float32)
    u = lambda k, shp: jax.random.uniform(k, shp, jnp.float32, 0.5, 1.5)
    return dict(
        Wc=n(ks[0], (U, 4, K)), bc=n(ks[1], (U,)),
        g0=1.0 + n(ks[2], (U,)), be0=n(ks[3], (U,)),
        m0=n(ks[4], (U,)), v0=u(ks[5], (U,)),
        W1=n(ks[6], (U, H, P)), b1=n(ks[7], (U, H)),
        g1=1.0 + n(ks[8], (U, H)), be1=n(ks[9], (U, H)),
        m1=n(ks[10], (U, H)), v1=u(ks[11], (U, H)),
        W2=n(ks[12], (U, H)), b2=n(ks[13], (U,)),
        g2=1.0 + n(ks[14], (U,)), be2=n(ks[15], (U,)),
        m2=n(ks[16], (U,)), v2=u(ks[17], (U,)),
        Wf=n(ks[18], (C, U)), bf=n(ks[19], (C,)),
    )


def kernel_params(raw):
    f32 = jnp.float32
    s0, sh0 = fold_bn(raw["g0"], raw["be0"], raw["m0"], raw["v0"])   # (U,)
    s1, sh1 = fold_bn(raw["g1"], raw["be1"], raw["m1"], raw["v1"])   # (U, H)
    s2, sh2 = fold_bn(raw["g2"], raw["be2"], raw["m2"], raw["v2"])   # (U,)
    eye = jnp.eye(U, dtype=f32)

    # Conv weight in im2col order (row = k*4 + c), BN0 scale folded in;
    # conv bias + BN0 shift folded into b0.
    wcol = jnp.transpose(raw["Wc"], (2, 1, 0)).reshape(K * 4, U)     # (76, U)
    wcol = wcol * s0[None, :]
    b0 = (sh0 + s0 * raw["bc"]).reshape(1, U)

    # FC1 as block-diagonal dense matmul: w1bd[p*U+u, v*H+h] = W1[u,h,p]*s1 (u==v).
    w1s = jnp.transpose(raw["W1"] * s1[:, :, None], (2, 0, 1))       # (P, U, H)
    w1bd = (w1s[:, :, None, :] * eye[None, :, :, None]).reshape(P * U, U * H)
    b1 = (sh1 + s1 * raw["b1"]).reshape(1, U * H)

    # FC2 as block-structured dense matmul: w2bd[u*H+h, v] = W2[u,h]*s2[u] (u==v).
    w2s = raw["W2"] * s2[:, None]                                    # (U, H)
    w2bd = (w2s[:, :, None] * eye[:, None, :]).reshape(U * H, U)
    b2 = (sh2 + s2 * raw["b2"]).reshape(1, U)

    # Final Linear padded to 128 output lanes for an unmasked store.
    wf = jnp.zeros((U, CPAD), f32).at[:, :C].set(raw["Wf"].T)
    bf = jnp.zeros((1, CPAD), f32).at[:, :C].set(raw["bf"][None, :])

    return dict(wcol=wcol, b0=b0, w1bd=w1bd, b1=b1, w2bd=w2bd, b2=b2,
                wf=wf, bf=bf)


# ----------------------------- pure-JAX reference -----------------------------
def ref_forward(x_ncl, raw):
    x = x_ncl.astype(jnp.float32)                                    # (B, 4, L)
    idx = jnp.arange(T)[:, None] + jnp.arange(K)[None, :]            # (T, K)
    xw = x[:, :, idx]                                                # (B, 4, T, K)
    conv = jnp.einsum("bctk,uck->but", xw, raw["Wc"]) + raw["bc"][None, :, None]
    s0, sh0 = fold_bn(raw["g0"], raw["be0"], raw["m0"], raw["v0"])
    act = jnp.exp(conv * s0[None, :, None] + sh0[None, :, None])
    pooled = jnp.stack(
        [jnp.max(act[:, :, p * STRIDE:p * STRIDE + POOL], axis=-1) for p in range(P)],
        axis=-1)                                                     # (B, U, P)
    h = jnp.einsum("bup,uhp->buh", pooled, raw["W1"]) + raw["b1"][None]
    s1, sh1 = fold_bn(raw["g1"], raw["be1"], raw["m1"], raw["v1"])
    h = jnp.maximum(h * s1[None] + sh1[None], 0.0)
    o2 = jnp.einsum("buh,uh->bu", h, raw["W2"]) + raw["b2"][None]
    s2, sh2 = fold_bn(raw["g2"], raw["be2"], raw["m2"], raw["v2"])
    o2 = jnp.maximum(o2 * s2[None] + sh2[None], 0.0)
    return o2 @ raw["Wf"].T + raw["bf"][None]


# ------------------------------------ main -------------------------------------
if __name__ == "__main__":
    key = jax.random.PRNGKey(0)
    kx, kp_key = jax.random.split(key)
    x = jax.random.normal(kx, (B, 4, L), jnp.float32)   # PyTorch NCL input

    raw = init_raw_params(kp_key)
    kp = kernel_params(raw)

    out = explainn_forward(x, kp)
    out = jax.block_until_ready(out)

    ref = ref_forward(x, raw)
    assert out.shape == (B, C)
    assert jnp.allclose(out, ref, rtol=1e-4, atol=1e-4), (out, ref)
    print("KERNEL_OK")
</pallas_src>

<mosaic_0001>
module attributes {stable_mosaic.version = 11 : i64} {
  func.func @_explainn_kernel(%arg0: i32, %arg1: memref<2x32x76xf32, #tpu.memory_space<vmem>>, %arg2: memref<76x8xf32, #tpu.memory_space<vmem>>, %arg3: memref<1x8xf32, #tpu.memory_space<vmem>>, %arg4: memref<32x800xf32, #tpu.memory_space<vmem>>, %arg5: memref<1x800xf32, #tpu.memory_space<vmem>>, %arg6: memref<800x8xf32, #tpu.memory_space<vmem>>, %arg7: memref<1x8xf32, #tpu.memory_space<vmem>>, %arg8: memref<8x128xf32, #tpu.memory_space<vmem>>, %arg9: memref<1x128xf32, #tpu.memory_space<vmem>>, %arg10: memref<2x128xf32, #tpu.memory_space<vmem>>) attributes {dimension_semantics = [#tpu.dimension_semantics<parallel>], iteration_bounds = array<i64: 1>, scalar_prefetch = 0 : i64, scratch_operands = 0 : i64, tpu.core_type = #tpu.core_type<tc>, window_params = [{transform_indices = @transform_0, window_bounds = array<i64: 2, 32, 76>}, {pipeline_mode = #tpu.pipeline_mode<synchronous>, transform_indices = @transform_1, window_bounds = array<i64: 76, 8>}, {pipeline_mode = #tpu.pipeline_mode<synchronous>, transform_indices = @transform_2, window_bounds = array<i64: 1, 8>}, {pipeline_mode = #tpu.pipeline_mode<synchronous>, transform_indices = @transform_3, window_bounds = array<i64: 32, 800>}, {pipeline_mode = #tpu.pipeline_mode<synchronous>, transform_indices = @transform_4, window_bounds = array<i64: 1, 800>}, {pipeline_mode = #tpu.pipeline_mode<synchronous>, transform_indices = @transform_5, window_bounds = array<i64: 800, 8>}, {pipeline_mode = #tpu.pipeline_mode<synchronous>, transform_indices = @transform_6, window_bounds = array<i64: 1, 8>}, {pipeline_mode = #tpu.pipeline_mode<synchronous>, transform_indices = @transform_7, window_bounds = array<i64: 8, 128>}, {pipeline_mode = #tpu.pipeline_mode<synchronous>, transform_indices = @transform_8, window_bounds = array<i64: 1, 128>}, {transform_indices = @transform_9, window_bounds = array<i64: 2, 128>}]} {
    %c0 = arith.constant 0 : index
    %c0_0 = arith.constant 0 : index
    %c0_1 = arith.constant 0 : index
    %0 = vector.load %arg1[%c0, %c0_0, %c0_1] : memref<2x32x76xf32, #tpu.memory_space<vmem>>, vector<2x32x76xf32>
    %1 = vector.shape_cast %0 : vector<2x32x76xf32> to vector<64x76xf32>
    %c0_2 = arith.constant 0 : index
    %c0_3 = arith.constant 0 : index
    %2 = vector.load %arg2[%c0_2, %c0_3] : memref<76x8xf32, #tpu.memory_space<vmem>>, vector<76x8xf32>
    %cst = arith.constant dense<0.000000e+00> : vector<64x8xf32>
    %3 = tpu.matmul %1, %2, %cst {dimension_numbers = #tpu.dot_dimension_numbers<[1], [0], [0], [1], [0, 0, 1, 1], [], []>} : vector<64x76xf32>, vector<76x8xf32>, vector<64x8xf32> -> vector<64x8xf32>
    %c0_4 = arith.constant 0 : index
    %c0_5 = arith.constant 0 : index
    %4 = vector.load %arg3[%c0_4, %c0_5] : memref<1x8xf32, #tpu.memory_space<vmem>>, vector<1x8xf32>
    %5 = vector.broadcast %4 : vector<1x8xf32> to vector<64x8xf32>
    %6 = arith.addf %3, %5 : vector<64x8xf32>
    %7 = math.exp %6 : vector<64x8xf32>
    %8 = vector.shape_cast %7 : vector<64x8xf32> to vector<2x32x8xf32>
    %9 = vector.extract_strided_slice %8 {offsets = [0, 0, 0], sizes = [2, 7, 8], strides = [1, 1, 1]} : vector<2x32x8xf32> to vector<2x7x8xf32>
    %cst_6 = arith.constant dense<0xFF800000> : vector<2x8xf32>
    %10 = vector.multi_reduction <maximumf>, %9, %cst_6 [1] : vector<2x7x8xf32> to vector<2x8xf32>
    %11 = vector.extract_strided_slice %8 {offsets = [0, 7, 0], sizes = [2, 7, 8], strides = [1, 1, 1]} : vector<2x32x8xf32> to vector<2x7x8xf32>
    %cst_7 = arith.constant dense<0xFF800000> : vector<2x8xf32>
    %12 = vector.multi_reduction <maximumf>, %11, %cst_7 [1] : vector<2x7x8xf32> to vector<2x8xf32>
    %13 = vector.extract_strided_slice %8 {offsets = [0, 14, 0], sizes = [2, 7, 8], strides = [1, 1, 1]} : vector<2x32x8xf32> to vector<2x7x8xf32>
    %cst_8 = arith.constant dense<0xFF800000> : vector<2x8xf32>
    %14 = vector.multi_reduction <maximumf>, %13, %cst_8 [1] : vector<2x7x8xf32> to vector<2x8xf32>
    %15 = vector.extract_strided_slice %8 {offsets = [0, 21, 0], sizes = [2, 7, 8], strides = [1, 1, 1]} : vector<2x32x8xf32> to vector<2x7x8xf32>
    %cst_9 = arith.constant dense<0xFF800000> : vector<2x8xf32>
    %16 = vector.multi_reduction <maximumf>, %15, %cst_9 [1] : vector<2x7x8xf32> to vector<2x8xf32>
    %17 = tpu.concatenate %10, %12, %14, %16 in 1 : vector<2x8xf32>, vector<2x8xf32>, vector<2x8xf32>, vector<2x8xf32> -> vector<2x32xf32>
    %c0_10 = arith.constant 0 : index
    %c0_11 = arith.constant 0 : index
    %18 = vector.load %arg4[%c0_10, %c0_11] : memref<32x800xf32, #tpu.memory_space<vmem>>, vector<32x800xf32>
    %cst_12 = arith.constant dense<0.000000e+00> : vector<2x800xf32>
    %19 = tpu.matmul %17, %18, %cst_12 {dimension_numbers = #tpu.dot_dimension_numbers<[1], [0], [0], [1], [0, 0, 1, 1], [], []>} : vector<2x32xf32>, vector<32x800xf32>, vector<2x800xf32> -> vector<2x800xf32>
    %c0_13 = arith.constant 0 : index
    %c0_14 = arith.constant 0 : index
    %20 = vector.load %arg5[%c0_13, %c0_14] : memref<1x800xf32, #tpu.memory_space<vmem>>, vector<1x800xf32>
    %21 = vector.broadcast %20 : vector<1x800xf32> to vector<2x800xf32>
    %22 = arith.addf %19, %21 : vector<2x800xf32>
    %cst_15 = arith.constant 0.000000e+00 : f32
    %23 = vector.broadcast %cst_15 : f32 to vector<2x800xf32>
    %24 = arith.maximumf %22, %23 : vector<2x800xf32>
    %c0_16 = arith.constant 0 : index
    %c0_17 = arith.constant 0 : index
    %25 = vector.load %arg6[%c0_16, %c0_17] : memref<800x8xf32, #tpu.memory_space<vmem>>, vector<800x8xf32>
    %cst_18 = arith.constant dense<0.000000e+00> : vector<2x8xf32>
    %26 = tpu.matmul %24, %25, %cst_18 {dimension_numbers = #tpu.dot_dimension_numbers<[1], [0], [0], [1], [0, 0, 1, 1], [], []>} : vector<2x800xf32>, vector<800x8xf32>, vector<2x8xf32> -> vector<2x8xf32>
    %c0_19 = arith.constant 0 : index
    %c0_20 = arith.constant 0 : index
    %27 = vector.load %arg7[%c0_19, %c0_20] : memref<1x8xf32, #tpu.memory_space<vmem>>, vector<1x8xf32>
    %28 = vector.broadcast %27 : vector<1x8xf32> to vector<2x8xf32>
    %29 = arith.addf %26, %28 : vector<2x8xf32>
    %cst_21 = arith.constant 0.000000e+00 : f32
    %30 = vector.broadcast %cst_21 : f32 to vector<2x8xf32>
    %31 = arith.maximumf %29, %30 : vector<2x8xf32>
    %c0_22 = arith.constant 0 : index
    %c0_23 = arith.constant 0 : index
    %32 = vector.load %arg8[%c0_22, %c0_23] : memref<8x128xf32, #tpu.memory_space<vmem>>, vector<8x128xf32>
    %cst_24 = arith.constant dense<0.000000e+00> : vector<2x128xf32>
    %33 = tpu.matmul %31, %32, %cst_24 {dimension_numbers = #tpu.dot_dimension_numbers<[1], [0], [0], [1], [0, 0, 1, 1], [], []>} : vector<2x8xf32>, vector<8x128xf32>, vector<2x128xf32> -> vector<2x128xf32>
    %c0_25 = arith.constant 0 : index
    %c0_26 = arith.constant 0 : index
    %34 = vector.load %arg9[%c0_25, %c0_26] : memref<1x128xf32, #tpu.memory_space<vmem>>, vector<1x128xf32>
    %35 = vector.broadcast %34 : vector<1x128xf32> to vector<2x128xf32>
    %36 = arith.addf %33, %35 : vector<2x128xf32>
    %c0_27 = arith.constant 0 : index
    %c0_28 = arith.constant 0 : index
    %37 = vector.load %arg10[%c0_27, %c0_28] : memref<2x128xf32, #tpu.memory_space<vmem>>, vector<2x128xf32>
    tpu.vector_store %arg10[%c0_27, %c0_28], %36 {strides = array<i32>} : memref<2x128xf32, #tpu.memory_space<vmem>>, vector<2x128xf32>,
    return
  }
  func.func @transform_0(%arg0: i32) -> (i32, i32, i32) {
    %c0_i32 = arith.constant 0 : i32
    %c0_i32_0 = arith.constant 0 : i32
    %c0_i32_1 = arith.constant 0 : i32
    return %arg0, %c0_i32, %c0_i32_0 : i32, i32, i32
  }
  func.func @transform_1(%arg0: i32) -> (i32, i32) {
    %c0_i32 = arith.constant 0 : i32
    %c0_i32_0 = arith.constant 0 : i32
    %c0_i32_1 = arith.constant 0 : i32
    return %c0_i32, %c0_i32_0 : i32, i32
  }
  func.func @transform_2(%arg0: i32) -> (i32, i32) {
    %c0_i32 = arith.constant 0 : i32
    %c0_i32_0 = arith.constant 0 : i32
    %c0_i32_1 = arith.constant 0 : i32
    return %c0_i32, %c0_i32_0 : i32, i32
  }
  func.func @transform_3(%arg0: i32) -> (i32, i32) {
    %c0_i32 = arith.constant 0 : i32
    %c0_i32_0 = arith.constant 0 : i32
    %c0_i32_1 = arith.constant 0 : i32
    return %c0_i32, %c0_i32_0 : i32, i32
  }
  func.func @transform_4(%arg0: i32) -> (i32, i32) {
    %c0_i32 = arith.constant 0 : i32
    %c0_i32_0 = arith.constant 0 : i32
    %c0_i32_1 = arith.constant 0 : i32
    return %c0_i32, %c0_i32_0 : i32, i32
  }
  func.func @transform_5(%arg0: i32) -> (i32, i32) {
    %c0_i32 = arith.constant 0 : i32
    %c0_i32_0 = arith.constant 0 : i32
    %c0_i32_1 = arith.constant 0 : i32
    return %c0_i32, %c0_i32_0 : i32, i32
  }
  func.func @transform_6(%arg0: i32) -> (i32, i32) {
    %c0_i32 = arith.constant 0 : i32
    %c0_i32_0 = arith.constant 0 : i32
    %c0_i32_1 = arith.constant 0 : i32
    return %c0_i32, %c0_i32_0 : i32, i32
  }
  func.func @transform_7(%arg0: i32) -> (i32, i32) {
    %c0_i32 = arith.constant 0 : i32
    %c0_i32_0 = arith.constant 0 : i32
    %c0_i32_1 = arith.constant 0 : i32
    return %c0_i32, %c0_i32_0 : i32, i32
  }
  func.func @transform_8(%arg0: i32) -> (i32, i32) {
    %c0_i32 = arith.constant 0 : i32
    %c0_i32_0 = arith.constant 0 : i32
    %c0_i32_1 = arith.constant 0 : i32
    return %c0_i32, %c0_i32_0 : i32, i32
  }
  func.func @transform_9(%arg0: i32) -> (i32, i32) {
    %c0_i32 = arith.constant 0 : i32
    %c0_i32_0 = arith.constant 0 : i32
    return %arg0, %c0_i32 : i32, i32
  }
}

</mosaic_0001>

<bundles_post_ra>
// kernel: explainn_forward.1
= control target key start
LH: loop header
LB: loop body
LE: loop exit
PB: predicated region body
PF: predicated region fallthrough
CT: control target
= control target key end

     0   :  { %vm58_vm0 = vcmask 621568   ;;  %s2163_s0 = inlined_call_operand.vmem [shape: f32[2,32,76], index: 0, kind: input, shape index: {}]   ;;  %s2164_s1 = inlined_call_operand.vmem [shape: f32[76,8], index: 1, kind: input, shape index: {}]   ;;  %s2165_s2 = inlined_call_operand.vmem [shape: f32[1,8], index: 2, kind: input, shape index: {}]   ;;  %s2166_s3 = inlined_call_operand.vmem [shape: f32[32,800], index: 3, kind: input, shape index: {}]   ;;  %s2167_s4 = inlined_call_operand.vmem [shape: f32[1,800], index: 4, kind: input, shape index: {}]   ;;  %s2168_s5 = inlined_call_operand.vmem [shape: f32[800,8], index: 5, kind: input, shape index: {}]   ;;  %s2169_s6 = inlined_call_operand.vmem [shape: f32[1,8], index: 6, kind: input, shape index: {}]   ;;  %s2170_s7 = inlined_call_operand.vmem [shape: f32[8,128], index: 7, kind: input, shape index: {}]   ;;  %s2171_s8 = inlined_call_operand.vmem [shape: f32[1,128], index: 8, kind: input, shape index: {}]   ;;  %s2172_s9 = inlined_call_operand.hbm [shape: f32[2,128], index: 9, kind: output, shape index: {}]  }
   0x1   :  { %v41_v0 = vld [vmem:[%s2164_s1] sm:$0xff]  ;;  %v42_v1 = vld [vmem:[%s2164_s1 + $0x8] sm:$0xff]  ;;  %v43_v2 = vld [vmem:[%s2164_s1 + $0x10] sm:$0xff] }
   0x2   :  { %v1370_v3 = vpack.c.bf16 %v42_v1, %v41_v0  ;;  %v44_v4 = vld [vmem:[%s2164_s1 + $0x18] sm:$0xff]  ;;  %v45_v6 = vld [vmem:[%s2164_s1 + $0x20] sm:$0xff]  ;;  %v46_v7 = vld [vmem:[%s2164_s1 + $0x28] sm:$0xff] }
   0x3   :  { %v1374_v5 = vpack.c.bf16 %v44_v4, %v43_v2  ;;  %v33_v8 = vld [vmem:[%s2163_s0] sm:$0xff]  ;;  %v1378_v9 = vpack.c.bf16 %v46_v7, %v45_v6  ;;  %v47_v10 = vld [vmem:[%s2164_s1 + $0x30] sm:$0xff]  ;;  %v48_v11 = vld [vmem:[%s2164_s1 + $0x38] sm:$0xff] }
   0x4   :  { %1371 = vmatprep.subr.bf16.mxu0 %v1370_v3  ;;  %1331 = vmatprep.mubr.msk.f32.mxu0 %vm58_vm0, %v33_v8 }
   0x5   :  { %1373 = vmatpush3.bf16.msra.mxu0 %v1370_v3 }
   0x6   :  { %1375 = vmatprep.subr.bf16.mxu0 %v1374_v5 }
   0x7   :  { %14 = vsyncpa [#allocation3], 0  ;;  %v1382_v12 = vpack.c.bf16 %v48_v11, %v47_v10  ;;  %v49_v13 = vld [vmem:[%s2164_s1 + $0x40] sm:$0xff]  ;;  %v50_v14 = vld [vmem:[%s2164_s1 + $0x48] sm:$0xf]  ;;  %vm83_vm1 = vcmask 1043456  }
   0x8   :  { %v1386_v15 = vpack.c.bf16 %v50_v14, %v49_v13  ;;  %vm1572_vm2 = vmmov 1   ;;  %v34_v16 = vld [vmem:[%s2163_s0 + $0x8] sm:$0xff]  ;;  %v35_v17 = vld [vmem:[%s2163_s0 + $0x10] sm:$0xff]  ;;  %v36_v18 = vld [vmem:[%s2163_s0 + $0x18] sm:$0xff]  ;;  %vm225_vm4 = vcmask 62464   ;;  %vm208_vm5 = vcmask 63488  }
   0x9   :  { %1377 = vmatpush3.bf16.msra.mxu0 %v1374_v5  ;;  %vm1387_vm3 = vmpackc.low %vm83_vm1, %vm1572_vm2  ;;  %v37_v19 = vld [vmem:[%s2163_s0 + $0x20] sm:$0xff]  ;;  %v38_v20 = vld [vmem:[%s2163_s0 + $0x28] sm:$0xff]  ;;  %vm223_vm6 = vcmask 64519   ;;  %vm243_vm7 = vcmask 64518   ;;  %vm245_vm8 = vcmask 61440   ;;  %vm265_vm9 = vcmask 60416  }
   0xa   :  { %1379 = vmatprep.subr.bf16.mxu0 %v1378_v9  ;;  %v39_v21 = vld [vmem:[%s2163_s0 + $0x30] sm:$0xff]  ;;  %v40_v22 = vld [vmem:[%s2163_s0 + $0x38] sm:$0xff]  ;;  %v313_v23 = vld [vmem:[%s2166_s3 + $0x8] sm:$0xff]  ;;  %vm263_vm10 = vcmask 64517   ;;  %vm285_vm11 = vcmask 1041409   ;;  %s1574_s21 = smov 8  }
   0xb   :  { %v320_v24 = vld [vmem:[%s2166_s3 + $0x40] sm:$0xff]  ;;  %v319_v27 = vld [vmem:[%s2166_s3 + $0x38] sm:$0xff]  ;;  %s1575_s22 = smov 24   ;;  %s1576_s23 = smov 16   ;;  %vm306_vm12 = vcmask 64512   ;;  %vm308_vm13 = vcmask 130048  }
   0xc   :  { %v312_v25 = vld [vmem:[%s2166_s3] sm:$0xff]  ;;  %v1392_v26 = vpack.c.bf16 %v320_v24, %v313_v23  ;;  %vm310_vm14 = vcmask 195584   ;;  %vm377_vm15 = vcmask 261120  }
   0xd   :  { %1381 = vmatpush3.bf16.msra.mxu0 %v1378_v9  ;;  %v1394_v28 = vpack.c.bf16 %v319_v27, %v312_v25  ;;  %v1158_v29 = vld [vmem:[%s2165_s2] ss:$0 sm:$0xff] }
   0xe   :  { %1383 = vmatprep.subr.bf16.mxu0 %v1382_v12  ;;  %1393 = vmatprep.subr.bf16.mxu1 %v1392_v26 }
   0xf   :  { %1395 = vmatpush1.bf16.msra.mxu1 %v1394_v28 }
  0x11   :  { %1385 = vmatpush3.bf16.msra.mxu0 %v1382_v12 }
  0x12   :  { %1388 = vmatprep.subr.msk.bf16.mxu0 %vm1387_vm3, %v1386_v15 }
  0x15   :  { %1391 = vmatpush3.bf16.msk.msra.mxu0 %vm1387_vm3, %v1386_v15 }
  0x18   :  { %1332 = vmatmul.mubr.msk.f32.vlgmr.msra.gmra.mrb[0].mxu0 %vm58_vm0, %v34_v16 }
  0x19   :  { %1334 = vmatprep.mubr.msk.f32.mxu0 %vm58_vm0, %v35_v17 }
  0x1c   :  { %1335 = vmatmul.mubr.msk.f32.gmra.mrb[2].mxu0 %vm58_vm0, %v36_v18 }
  0x1d   :  { %1337 = vmatprep.mubr.msk.f32.mxu0 %vm58_vm0, %v37_v19 }
  0x20   :  { %1338 = vmatmul.mubr.msk.f32.gmra.mrb[4].mxu0 %vm58_vm0, %v38_v20 }
  0x21   :  { %1340 = vmatprep.mubr.msk.f32.mxu0 %vm58_vm0, %v39_v21 }
  0x24   :  { %1341 = vmatmul.mubr.msk.f32.gmra.mrb[6].mxu0 %vm58_vm0, %v40_v22  ;;  %vm1578_vm0 = vmmov 0  }
  0xeb   :  { %v1333_v30 = vpop.f32.mrb[0].mxu0 }
  0xec   :  { %v159_v31 = vadd.f32 %v1333_v30, %v1158_v29  ;;  %v153_v32 = vpop.f32.mrb[1].mxu0  ;;  %v327_v30 = vld [vmem:[%s2166_s3 + $0x78] sm:$0xff] }
  0xed   :  { %v154_v33 = vadd.f32 %v1158_v29, %v153_v32 }
  0xee   :  { %v194_v34 = vmul.f32 1.442695, %v159_v31  ;;  %v334_v31 = vld [vmem:[%s2166_s3 + $0xb0] sm:$0xff] }
  0xef   :  { %v192_v35 = vmul.f32 1.442695, %v154_v33  ;;  %v1336_v36 = vpop.f32.mrb[2].mxu0 }
  0xf0   :  { %1532 = vpow2.f32 %v194_v34  ;;  %v169_v37 = vadd.f32 %v1336_v36, %v1158_v29  ;;  %v163_v38 = vpop.f32.mrb[3].mxu0  ;;  %v326_v36 = vld [vmem:[%s2166_s3 + $0x70] sm:$0xff] }
  0xf1   :  { %1534 = vpow2.f32 %v192_v35  ;;  %v164_v39 = vadd.f32 %v1158_v29, %v163_v38 }
  0xf2   :  { %v198_v40 = vmul.f32 1.442695, %v169_v37  ;;  %v333_v37 = vld [vmem:[%s2166_s3 + $0xa8] sm:$0xff] }
  0xf3   :  { %v196_v41 = vmul.f32 1.442695, %v164_v39  ;;  %v1339_v42 = vpop.f32.mrb[4].mxu0 }
  0xf4   :  { %1536 = vpow2.f32 %v198_v40  ;;  %v179_v43 = vadd.f32 %v1339_v42, %v1158_v29  ;;  %v173_v44 = vpop.f32.mrb[5].mxu0 }
  0xf5   :  { %1538 = vpow2.f32 %v196_v41  ;;  %v174_v45 = vadd.f32 %v1158_v29, %v173_v44 }
  0xf6   :  { %v202_v46 = vmul.f32 1.442695, %v179_v43  ;;  %v1396_v43 = vpack.c.bf16 %v334_v31, %v327_v30  ;;  %v675_v31 = vld [vmem:[%s2168_s5 + $0x20] sm:$0xff] }
  0xf7   :  { %v200_v47 = vmul.f32 1.442695, %v174_v45  ;;  %v1342_v48 = vpop.f32.mrb[6].mxu0 }
  0xf8   :  { %1540 = vpow2.f32 %v202_v46  ;;  %v189_v49 = vadd.f32 %v1342_v48, %v1158_v29  ;;  %v183_v50 = vpop.f32.mrb[7].mxu0  ;;  %v315_v48 = vld [vmem:[%s2166_s3 + $0x18] sm:$0xff]  ;;  %1397 = vmatprep.subr.bf16.mxu1 %v1396_v43  ;;  %v679_v43 = vld [vmem:[%s2168_s5 + $0x40] sm:$0xff] }
  0xf9   :  { %1542 = vpow2.f32 %v200_v47  ;;  %v184_v51 = vadd.f32 %v1158_v29, %v183_v50  ;;  %v1398_v47 = vpack.c.bf16 %v333_v37, %v326_v36  ;;  %v677_v37 = vld [vmem:[%s2168_s5 + $0x30] sm:$0xff] }
  0xfa   :  { %v1533_v52 = vpop.eup %1532  ;;  %v206_v53 = vmul.f32 1.442695, %v189_v49  ;;  %v322_v49 = vld [vmem:[%s2166_s3 + $0x50] sm:$0xff] }
  0xfb   :  { %v1535_v54 = vpop.eup %1534  ;;  %v204_v55 = vmul.f32 1.442695, %v184_v51  ;;  %v226_v56 = vsel %vm225_vm4, %v1533_v52, -inf  ;;  %v244_v1 = vsel %vm243_vm7, %v1533_v52, -inf  ;;  %1399 = vmatpush1.bf16.msra.mxu1 %v1398_v47 }
  0xfc   :  { %v209_v57 = vsel %vm208_vm5, %v1535_v54, -inf  ;;  %1544 = vpow2.f32 %v206_v53  ;;  %v224_v58 = vsel %vm223_vm6, %v1535_v54, -inf }
  0xfd   :  { %v210_v59 = vrot.slane %v209_v57, 4  ;;  %1546 = vpow2.f32 %v204_v55  ;;  %v227_v60 = vmax.f32 %v224_v58, %v226_v56 }
  0xfe   :  { %v1537_v61 = vpop.eup %1536 }
  0xff   :  { %v1539_v62 = vpop.eup %1538  ;;  %v228_v63 = vrot.slane %v227_v60, 4  ;;  %v266_v0 = vsel %vm265_vm9, %v1537_v61, -inf  ;;  %v211_v4 = vmax.f32 %v209_v57, %v210_v59  ;;  %v1573_v59 = vmov 0.0  }
 0x100   :  { %v246_v2 = vsel %vm245_vm8, %v1539_v62, -inf  ;;  %v264_v3 = vsel %vm263_vm10, %v1539_v62, -inf  ;;  %445 = vmatprep.mubr.f32.mxu1 %v1573_v59 }
 0x101   :  { %v229_v5 = vmax.f32 %v227_v60, %v228_v63  ;;  %v267_v6 = vmax.f32 %v264_v3, %v266_v0  ;;  %v247_v7 = vmax.f32 %v244_v1, %v246_v2  ;;  %v212_v15 = vrot.slane %v211_v4, 2 }
 0x102   :  { %v1541_v8 = vpop.eup %1540  ;;  %v1400_v60 = vpack.c.bf16 %v322_v49, %v315_v48  ;;  %v681_v49 = vld [vmem:[%s2168_s5 + $0x50] sm:$0xff] }
 0x103   :  { %v1543_v9 = vpop.eup %1542  ;;  %v235_v10 = vsel %vm225_vm4, %v1541_v8, -inf  ;;  %v268_v11 = vrot.slane %v267_v6, 4  ;;  %v248_v14 = vrot.slane %v247_v7, 4  ;;  %v230_v17 = vrot.slane %v229_v5, 2 }
 0x104   :  { %v216_v12 = vsel %vm208_vm5, %v1543_v9, -inf  ;;  %v234_v13 = vsel %vm223_vm6, %v1543_v9, -inf  ;;  %v254_v23 = vsel %vm243_vm7, %v1541_v8, -inf  ;;  %v213_v29 = vmax.f32 %v211_v4, %v212_v15  ;;  %1401 = vmatprep.subr.bf16.mxu1 %v1400_v60  ;;  %v314_v60 = vld [vmem:[%s2166_s3 + $0x10] sm:$0xff] }
 0x105   :  { %v217_v16 = vrot.slane %v216_v12, 4  ;;  %v236_v18 = vmax.f32 %v234_v13, %v235_v10  ;;  %v269_v19 = vmax.f32 %v267_v6, %v268_v11  ;;  %v249_v21 = vmax.f32 %v247_v7, %v248_v14 }
 0x106   :  { %v1545_v20 = vpop.eup %1544  ;;  %v231_v32 = vmax.f32 %v229_v5, %v230_v17  ;;  %v214_v46 = vrot.slane %v213_v29, 1  ;;  %v688_v17 = vld [vmem:[%s2168_s5 + $0x88] sm:$0xff] }
 0x107   :  { %v1547_v22 = vpop.eup %1546  ;;  %v237_v24 = vrot.slane %v236_v18, 4  ;;  %v275_v25 = vsel %vm265_vm9, %v1545_v20, -inf  ;;  %v218_v28 = vmax.f32 %v216_v12, %v217_v16  ;;  %v270_v34 = vrot.slane %v269_v19, 2  ;;  %v687_v16 = vld [vmem:[%s2168_s5 + $0x80] sm:$0xff]  ;;  %v672_v20 = vld [vmem:[%s2168_s5 + $0x8] sm:$0xff] }
 0x108   :  { %v255_v26 = vsel %vm245_vm8, %v1547_v22, -inf  ;;  %v274_v27 = vsel %vm263_vm10, %v1547_v22, -inf  ;;  %v250_v38 = vrot.slane %v249_v21, 2  ;;  %v232_v50 = vrot.slane %v231_v32, 1  ;;  %v690_v22 = vld [vmem:[%s2168_s5 + $0x98] sm:$0xff] }
 0x109   :  { %v238_v33 = vmax.f32 %v236_v18, %v237_v24  ;;  %v276_v35 = vmax.f32 %v274_v27, %v275_v25  ;;  %v256_v39 = vmax.f32 %v254_v23, %v255_v26  ;;  %v219_v40 = vrot.slane %v218_v28, 2  ;;  %v671_v18 = vld [vmem:[%s2168_s5] sm:$0xff]  ;;  %v673_v25 = vld [vmem:[%s2168_s5 + $0x10] sm:$0xff]  ;;  %v674_v26 = vld [vmem:[%s2168_s5 + $0x18] sm:$0xff] }
 0x10a   :  { %v271_v52 = vmax.f32 %v269_v19, %v270_v34  ;;  %v251_v54 = vmax.f32 %v249_v21, %v250_v38  ;;  %v215_v63 = vmax.f32 %v213_v29, %v214_v46  ;;  %v233_v0 = vmax.f32 %v231_v32, %v232_v50  ;;  %v689_v21 = vld [vmem:[%s2168_s5 + $0x90] sm:$0xff]  ;;  %v691_v27 = vld [vmem:[%s2168_s5 + $0xa0] sm:$0xff]  ;;  %v676_v32 = vld [vmem:[%s2168_s5 + $0x28] sm:$0xff] }
 0x10b   :  { %v239_v41 = vrot.slane %v238_v33, 2  ;;  %v277_v42 = vrot.slane %v276_v35, 4  ;;  %v257_v44 = vrot.slane %v256_v39, 4  ;;  %v220_v45 = vmax.f32 %v218_v28, %v219_v40  ;;  %v692_v28 = vld [vmem:[%s2168_s5 + $0xa8] sm:$0xff]  ;;  %v694_v34 = vld [vmem:[%s2168_s5 + $0xb8] sm:$0xff] }
 0x10c   :  { %v272_v2 = vrot.slane %v271_v52, 1  ;;  %v252_v4 = vrot.slane %v251_v54, 1  ;;  %v1422_v19 = vpack.c.bf16 %v688_v17, %v687_v16  ;;  %v1424_v23 = vpack.c.bf16 %v672_v20, %v671_v18  ;;  %v678_v38 = vld [vmem:[%s2168_s5 + $0x38] sm:$0xff]  ;;  %v696_v40 = vld [vmem:[%s2168_s5 + $0xc8] sm:$0xff]  ;;  %v338_v16 = vld [vmem:[%s2166_s3 + $0xd0] sm:$0xff] }
 0x10d   :  { %v240_v51 = vmax.f32 %v238_v33, %v239_v41  ;;  %v278_v53 = vmax.f32 %v276_v35, %v277_v42  ;;  %v258_v55 = vmax.f32 %v256_v39, %v257_v44  ;;  %v221_v56 = vrot.slane %v220_v45, 1  ;;  %v693_v33 = vld [vmem:[%s2168_s5 + $0xb0] sm:$0xff]  ;;  %v695_v39 = vld [vmem:[%s2168_s5 + $0xc0] sm:$0xff]  ;;  %v680_v44 = vld [vmem:[%s2168_s5 + $0x48] sm:$0xff] }
 0x10e   :  { %v273_v10 = vmax.f32 %v271_v52, %v272_v2  ;;  %v253_v12 = vmax.f32 %v251_v54, %v252_v4  ;;  %v1426_v24 = vpack.c.bf16 %v690_v22, %v689_v21  ;;  %1423 = vmatprep.subr.bf16.mxu0 %v1422_v19  ;;  %v1428_v29 = vpack.c.bf16 %v674_v26, %v673_v25  ;;  %v698_v46 = vld [vmem:[%s2168_s5 + $0xd8] sm:$0xff]  ;;  %v700_v52 = vld [vmem:[%s2168_s5 + $0xe8] sm:$0xff]  ;;  %v330_v19 = vld [vmem:[%s2166_s3 + $0x90] sm:$0xff] }
 0x10f   :  { %v241_v57 = vrot.slane %v240_v51, 1  ;;  %v279_v58 = vrot.slane %v278_v53, 2  ;;  %v259_v61 = vrot.slane %v258_v55, 2  ;;  %v222_v62 = vmax.f32 %v220_v45, %v221_v56  ;;  %1425 = vmatpush3.bf16.msra.mxu0 %v1424_v23  ;;  %v697_v45 = vld [vmem:[%s2168_s5 + $0xd0] sm:$0xff]  ;;  %v682_v50 = vld [vmem:[%s2168_s5 + $0x58] sm:$0xff]  ;;  %v684_v56 = vld [vmem:[%s2168_s5 + $0x68] sm:$0xff] }
 0x110   :  { %1427 = vmatprep.subr.bf16.mxu0 %v1426_v24  ;;  %v1430_v30 = vpack.c.bf16 %v692_v28, %v691_v27  ;;  %v1432_v35 = vpack.c.bf16 %v676_v32, %v675_v31  ;;  %v1434_v36 = vpack.c.bf16 %v694_v34, %v693_v33  ;;  %v1436_v41 = vpack.c.bf16 %v678_v38, %v677_v37  ;;  %v337_v20 = vld [vmem:[%s2166_s3 + $0xc8] sm:$0xff]  ;;  %v318_v22 = vld [vmem:[%s2166_s3 + $0x30] sm:$0xff]  ;;  %v332_v26 = vld [vmem:[%s2166_s3 + $0xa0] sm:$0xff] }
 0x111   :  { %v242_v1 = vmax.f32 %v240_v51, %v241_v57  ;;  %v280_v3 = vmax.f32 %v278_v53, %v279_v58  ;;  %v260_v5 = vmax.f32 %v258_v55, %v259_v61  ;;  %v1741_v6 = vsel %vm285_vm11, %v222_v62, %v215_v63  ;;  %v699_v51 = vld [vmem:[%s2168_s5 + $0xe0] sm:$0xff]  ;;  %v321_v61 = vld [vmem:[%s2166_s3 + $0x48] sm:$0xff]  ;;  %v339_v27 = vld [vmem:[%s2166_s3 + $0xd8] sm:$0xff] }
 0x112   :  { %v1438_v42 = vpack.c.bf16 %v696_v40, %v695_v39  ;;  %v1440_v47 = vpack.c.bf16 %v680_v44, %v679_v43  ;;  %v1442_v48 = vpack.c.bf16 %v698_v46, %v697_v45  ;;  %v1444_v53 = vpack.c.bf16 %v682_v50, %v681_v49  ;;  %v683_v55 = vld [vmem:[%s2168_s5 + $0x60] sm:$0xff]  ;;  %v329_v62 = vld [vmem:[%s2166_s3 + $0x88] sm:$0xff]  ;;  %v721_v34 = vld [vmem:[%s2168_s5 + $0x190] sm:$0xff] }
 0x113   :  { %v290_v7 = vsel %vm285_vm11, %v242_v1, %v233_v0  ;;  %v281_v8 = vrot.slane %v280_v3, 1  ;;  %v261_v9 = vrot.slane %v260_v5, 1  ;;  %1429 = vmatpush3.bf16.msra.mxu0 %v1428_v29  ;;  %v1446_v54 = vpack.c.bf16 %v700_v52, %v699_v51  ;;  %v336_v63 = vld [vmem:[%s2166_s3 + $0xc0] sm:$0xff]  ;;  %v325_v23 = vld [vmem:[%s2166_s3 + $0x68] sm:$0xff]  ;;  %v705_v38 = vld [vmem:[%s2168_s5 + $0x110] sm:$0xff] }
 0x114   :  { %291 = vrot.lane.b32.xlu0 %v290_v7, %s1574_s21  ;;  %1431 = vmatprep.subr.bf16.mxu0 %v1430_v30  ;;  %v1448_v57 = vpack.c.bf16 %v684_v56, %v683_v55  ;;  %v328_v7 = vld [vmem:[%s2166_s3 + $0x80] sm:$0xff]  ;;  %v1414_v21 = vpack.c.bf16 %v337_v20, %v330_v19  ;;  %v1417_v24 = vpack.c.bf16 %v325_v23, %v318_v22  ;;  %v1577_v25 = vmov 0.0|0.0   ;;  %v720_v29 = vld [vmem:[%s2168_s5 + $0x188] sm:$0xff]  ;;  %v706_v39 = vld [vmem:[%s2168_s5 + $0x118] sm:$0xff] }
 0x115   :  { %v282_v11 = vmax.f32 %v280_v3, %v281_v8  ;;  %v262_v13 = vmax.f32 %v260_v5, %v261_v9  ;;  %v1402_v3 = vpack.c.bf16 %v321_v61, %v314_v60  ;;  %v1404_v5 = vpack.c.bf16 %v336_v63, %v329_v62  ;;  %v335_v8 = vld [vmem:[%s2166_s3 + $0xb8] sm:$0xff]  ;;  %v719_v28 = vld [vmem:[%s2168_s5 + $0x180] sm:$0xff]  ;;  %v704_v33 = vld [vmem:[%s2168_s5 + $0x108] sm:$0xff] }
 0x116   :  { %v1420_v30 = vpack.c.bf16 %v339_v27, %v332_v26  ;;  %v1454_v31 = vpack.c.bf16 %v720_v29, %v719_v28  ;;  %v703_v32 = vld [vmem:[%s2168_s5 + $0x100] sm:$0xff]  ;;  %v708_v45 = vld [vmem:[%s2168_s5 + $0x128] sm:$0xff]  ;;  %v725_v46 = vld [vmem:[%s2168_s5 + $0x1b0] sm:$0xff]  ;;  %v342_v23 = vlaneseq }
 0x117   :  { %v302_v14 = vsel %vm285_vm11, %v282_v11, %v273_v10  ;;  %v296_v15 = vsel %vm285_vm11, %v262_v13, %v253_v12  ;;  %1433 = vmatpush3.bf16.msra.mxu0 %v1432_v35  ;;  %v317_v10 = vld [vmem:[%s2166_s3 + $0x28] sm:$0xff]  ;;  %v1406_v11 = vpack.c.bf16 %v335_v8, %v328_v7  ;;  %v316_v13 = vld [vmem:[%s2166_s3 + $0x20] sm:$0xff]  ;;  %v722_v35 = vld [vmem:[%s2168_s5 + $0x198] sm:$0xff] }
 0x118   :  { %303 = vrot.lane.b32.xlu1 %v302_v14, %s1575_s22  ;;  %297 = vrot.lane.b32.xlu0 %v296_v15, %s1576_s23  ;;  %v323_v14 = vld [vmem:[%s2166_s3 + $0x58] sm:$0xff]  ;;  %v1458_v37 = vpack.c.bf16 %v722_v35, %v721_v34  ;;  %v723_v40 = vld [vmem:[%s2168_s5 + $0x1a0] sm:$0xff] }
 0x119   :  { %1435 = vmatprep.subr.bf16.mxu0 %v1434_v36  ;;  %v331_v15 = vld [vmem:[%s2166_s3 + $0x98] sm:$0xff]  ;;  %v1410_v17 = vpack.c.bf16 %v323_v14, %v316_v13  ;;  %v1456_v36 = vpack.c.bf16 %v704_v33, %v703_v32  ;;  %v707_v44 = vld [vmem:[%s2168_s5 + $0x120] sm:$0xff]  ;;  %v709_v50 = vld [vmem:[%s2168_s5 + $0x130] sm:$0xff] }
 0x11a   :  { %v1412_v18 = vpack.c.bf16 %v338_v16, %v331_v15  ;;  %v710_v51 = vld [vmem:[%s2168_s5 + $0x138] sm:$0xff]  ;;  %v727_v52 = vld [vmem:[%s2168_s5 + $0x1c0] sm:$0xff]  ;;  %v701_v60 = vld [vmem:[%s2168_s5 + $0xf0] sm:$0xff] }
 0x11b   :  { %1437 = vmatpush3.bf16.msra.mxu0 %v1436_v41  ;;  %v724_v41 = vld [vmem:[%s2168_s5 + $0x1a8] sm:$0xff]  ;;  %v711_v56 = vld [vmem:[%s2168_s5 + $0x140] sm:$0xff]  ;;  %v702_v61 = vld [vmem:[%s2168_s5 + $0xf8] sm:$0xff] }
 0x11c   :  { %1439 = vmatprep.subr.bf16.mxu0 %v1438_v42  ;;  %v1460_v42 = vpack.c.bf16 %v706_v39, %v705_v38  ;;  %v1462_v43 = vpack.c.bf16 %v724_v41, %v723_v40  ;;  %v729_v62 = vld [vmem:[%s2168_s5 + $0x1d0] sm:$0xff]  ;;  %v1450_v63 = vpack.c.bf16 %v702_v61, %v701_v60  ;;  %v714_v7 = vld [vmem:[%s2168_s5 + $0x158] sm:$0xff]  ;;  %v715_v13 = vld [vmem:[%s2168_s5 + $0x160] sm:$0xff] }
 0x11d   :  { %v716_v14 = vld [vmem:[%s2168_s5 + $0x168] sm:$0xff]  ;;  %v717_v20 = vld [vmem:[%s2168_s5 + $0x170] sm:$0xff]  ;;  %v2017_v27 = vld [vmem:[%s2167_s4] sm:$0x7f] }
 0x11e   :  { %v1480_v16 = vpack.c.bf16 %v716_v14, %v715_v13  ;;  %v735_v35 = vld [vmem:[%s2168_s5 + $0x200] sm:$0xff]  ;;  %v753_v39 = vld [vmem:[%s2168_s5 + $0x290] sm:$0xff]  ;;  %v754_v40 = vld [vmem:[%s2168_s5 + $0x298] sm:$0xff] }
 0x11f   :  { %1441 = vmatpush3.bf16.msra.mxu0 %v1440_v47  ;;  %v726_v47 = vld [vmem:[%s2168_s5 + $0x1b8] sm:$0xff]  ;;  %v768_v60 = vld [vmem:[%s2168_s5 + $0x308] sm:$0xff] }
 0x120   :  { %1443 = vmatprep.subr.bf16.mxu0 %v1442_v48  ;;  %v1464_v48 = vpack.c.bf16 %v708_v45, %v707_v44  ;;  %v1466_v49 = vpack.c.bf16 %v726_v47, %v725_v46  ;;  %v1490_v45 = vpack.c.bf16 %v754_v40, %v753_v39  ;;  %v737_v46 = vld [vmem:[%s2168_s5 + $0x210] sm:$0xff]  ;;  %v738_v47 = vld [vmem:[%s2168_s5 + $0x218] sm:$0xff]  ;;  %v747_v40 = vld [vmem:[%s2168_s5 + $0x260] sm:$0xff] }
 0x123   :  { %1445 = vmatpush3.bf16.msra.mxu0 %v1444_v53  ;;  %v728_v53 = vld [vmem:[%s2168_s5 + $0x1c8] sm:$0xff] }
 0x124   :  { %1447 = vmatprep.subr.bf16.mxu0 %v1446_v54  ;;  %v1468_v54 = vpack.c.bf16 %v710_v51, %v709_v50  ;;  %v1470_v55 = vpack.c.bf16 %v728_v53, %v727_v52  ;;  %v756_v50 = vld [vmem:[%s2168_s5 + $0x2a8] sm:$0xff]  ;;  %v1492_v52 = vpack.c.bf16 %v738_v47, %v737_v46  ;;  %v739_v53 = vld [vmem:[%s2168_s5 + $0x220] sm:$0xff]  ;;  %v749_v47 = vld [vmem:[%s2168_s5 + $0x270] sm:$0xff] }
 0x127   :  { %1449 = vmatpush3.bf16.msra.mxu0 %v1448_v57  ;;  %v712_v57 = vld [vmem:[%s2168_s5 + $0x148] sm:$0xff] }
 0x128   :  { %1451 = vmatprep.subr.bf16.mxu0 %v1450_v63  ;;  %v757_v63 = vld [vmem:[%s2168_s5 + $0x2b0] sm:$0xff] }
 0x186   :  { %v292_v58 = vpop.permute.xlu0 %291 }
 0x187   :  { %v307_v1 = vsel %vm306_vm12, %v1741_v6, %v292_v58  ;;  %v324_v6 = vld [vmem:[%s2166_s3 + $0x60] sm:$0xff]  ;;  %v1472_v58 = vpack.c.bf16 %v712_v57, %v711_v56  ;;  %v740_v57 = vld [vmem:[%s2168_s5 + $0x228] sm:$0xff] }
 0x188   :  { %v1408_v12 = vpack.c.bf16 %v324_v6, %v317_v10  ;;  %v732_v10 = vld [vmem:[%s2168_s5 + $0x1e8] sm:$0xff]  ;;  %v751_v6 = vld [vmem:[%s2168_s5 + $0x280] sm:$0xff] }
 0x18a   :  { %v304_v0 = vpop.permute.xlu1 %303  ;;  %v298_v2 = vpop.permute.xlu0 %297 }
 0x18b   :  { %v309_v4 = vsel %vm308_vm13, %v307_v1, %v298_v2  ;;  %v685_v1 = vld [vmem:[%s2168_s5 + $0x70] sm:$0xff]  ;;  %v686_v2 = vld [vmem:[%s2168_s5 + $0x78] sm:$0xff] }
 0x18c   :  { %v311_v9 = vsel %vm310_vm14, %v309_v4, %v304_v0  ;;  %v730_v0 = vld [vmem:[%s2168_s5 + $0x1d8] sm:$0xff]  ;;  %v1452_v4 = vpack.c.bf16 %v686_v2, %v685_v1  ;;  %v1496_v2 = vpack.c.bf16 %v740_v57, %v739_v53 }
 0x18d   :  { %1168 = vmatmul.mubr.msk.f32.vlgmr.msra.gmra.mrb[0].mxu1 %vm377_vm15, %v311_v9 }
 0x18e   :  { %1403 = vmatpush1.bf16.msra.mxu1 %v1402_v3  ;;  %516 = vmatprep.mubr.f32.mxu1 %v1573_v59  ;;  %v1474_v3 = vpack.c.bf16 %v730_v0, %v729_v62  ;;  %v758_v0 = vld [vmem:[%s2168_s5 + $0x2b8] sm:$0xff] }
 0x18f   :  { %1405 = vmatprep.subr.bf16.mxu1 %v1404_v5  ;;  %v713_v5 = vld [vmem:[%s2168_s5 + $0x150] sm:$0xff]  ;;  %1453 = vmatpush3.bf16.msra.mxu0 %v1452_v4 }
 0x190   :  { %v1476_v8 = vpack.c.bf16 %v714_v7, %v713_v5  ;;  %v1498_v7 = vpack.c.bf16 %v758_v0, %v757_v63 }
 0x192   :  { %1407 = vmatpush1.bf16.msra.mxu1 %v1406_v11 }
 0x193   :  { %1409 = vmatprep.subr.bf16.mxu1 %v1408_v12  ;;  %v752_v12 = vld [vmem:[%s2168_s5 + $0x288] sm:$0xff] }
 0x194   :  { %v1486_v15 = vpack.c.bf16 %v752_v12, %v751_v6  ;;  %v760_v12 = vld [vmem:[%s2168_s5 + $0x2c8] sm:$0xff] }
 0x195   :  { %1169 = vmatmul.mubr.msk.f32.vlgmr.msra.gmra.mrb[2].mxu1 %vm377_vm15, %v311_v9 }
 0x196   :  { %1411 = vmatpush1.bf16.msra.mxu1 %v1410_v17  ;;  %587 = vmatprep.mubr.f32.mxu1 %v1573_v59  ;;  %v733_v17 = vld [vmem:[%s2168_s5 + $0x1f0] sm:$0xff] }
 0x197   :  { %1413 = vmatprep.subr.bf16.mxu1 %v1412_v18  ;;  %1487 = vmatprep.subr.bf16.mxu0 %v1486_v15  ;;  %v734_v18 = vld [vmem:[%s2168_s5 + $0x1f8] sm:$0xff] }
 0x198   :  { %v1482_v19 = vpack.c.bf16 %v734_v18, %v733_v17 }
 0x19a   :  { %1415 = vmatpush1.bf16.msra.mxu1 %v1414_v21  ;;  %v718_v21 = vld [vmem:[%s2168_s5 + $0x178] sm:$0xff] }
 0x19b   :  { %1416 = vmatprep.subr.bf16.mxu1 %v1577_v25  ;;  %v1484_v22 = vpack.c.bf16 %v718_v21, %v717_v20  ;;  %v744_v20 = vld [vmem:[%s2168_s5 + $0x248] sm:$0xff] }
 0x19d   :  { %1170 = vmatmul.mubr.msk.f32.vlgmr.msra.gmra.mrb[4].mxu1 %vm377_vm15, %v311_v9 }
 0x19e   :  { %1418 = vmatpush3.bf16.msra.mxu1 %v1417_v24  ;;  %1351 = vmatprep.mubr.msk.f32.mxu1 %vm1578_vm0, %v1573_v59  ;;  %v2011_v24 = vshrl.u32 %v342_v23, 7  ;;  %v762_v23 = vld [vmem:[%s2168_s5 + $0x2d8] sm:$0xff] }
 0x19f   :  { %1419 = vmatprep.subr.bf16.mxu1 %v1577_v25 }
 0x1a0   :  { %v344_v26 = vsub.s32 0, %v2011_v24  ;;  %v348_v28 = vsub.s32 1, %v2011_v24  ;;  %v352_v34 = vsub.s32 2, %v2011_v24  ;;  %v356_v38 = vsub.s32 3, %v2011_v24 }
 0x1a1   :  { %v364_v62 = vsub.s32 5, %v2011_v24  ;;  %v368_v18 = vsub.s32 6, %v2011_v24 }
 0x1a2   :  { %1421 = vmatpush3.bf16.msra.mxu1 %v1420_v30  ;;  %v345_v29 = vrot.slane %v2017_v27, %v344_v26  ;;  %v349_v30 = vrot.slane %v2017_v27, %v348_v28  ;;  %v353_v44 = vrot.slane %v2017_v27, %v352_v34 }
 0x1a3   :  { %1455 = vmatprep.subr.bf16.mxu1 %v1454_v31  ;;  %v365_v6 = vrot.slane %v2017_v27, %v364_v62 }
 0x1a5   :  { %1352 = vmatmul.mubr.msk.f32.vlgmr.msra.gmra.mrb[6].mxu1 %vm377_vm15, %v311_v9  ;;  %v731_v9 = vld [vmem:[%s2168_s5 + $0x1e0] sm:$0xff] }
 0x1a6   :  { %1457 = vmatpush3.bf16.msra.mxu1 %v1456_v36  ;;  %v1478_v11 = vpack.c.bf16 %v732_v10, %v731_v9  ;;  %v736_v36 = vld [vmem:[%s2168_s5 + $0x208] sm:$0xff]  ;;  %v769_v9 = vld [vmem:[%s2168_s5 + $0x310] sm:$0xff]  ;;  %v770_v10 = vld [vmem:[%s2168_s5 + $0x318] sm:$0xff] }
 0x1a7   :  { %1459 = vmatprep.subr.bf16.mxu1 %v1458_v37  ;;  %v1522_v15 = vpack.c.bf16 %v770_v10, %v769_v9 }
 0x1aa   :  { %1461 = vmatpush3.bf16.msra.mxu1 %v1460_v42  ;;  %v1488_v42 = vpack.c.bf16 %v736_v36, %v735_v35  ;;  %v360_v36 = vsub.s32 4, %v2011_v24  ;;  %v766_v24 = vld [vmem:[%s2168_s5 + $0x2f8] sm:$0xff] }
 0x1ab   :  { %1463 = vmatprep.subr.bf16.mxu1 %v1462_v43 }
 0x1ae   :  { %1465 = vmatpush3.bf16.msra.mxu1 %v1464_v48  ;;  %v357_v48 = vrot.slane %v2017_v27, %v356_v38 }
 0x1af   :  { %1467 = vmatprep.subr.bf16.mxu1 %v1466_v49  ;;  %v755_v49 = vld [vmem:[%s2168_s5 + $0x2a0] sm:$0xff] }
 0x1b0   :  { %v1494_v56 = vpack.c.bf16 %v756_v50, %v755_v49 }
 0x1b2   :  { %1469 = vmatpush3.bf16.msra.mxu1 %v1468_v54 }
 0x1b3   :  { %1471 = vmatprep.subr.bf16.mxu1 %v1470_v55 }
 0x1b6   :  { %1473 = vmatpush3.bf16.msra.mxu1 %v1472_v58  ;;  %v767_v58 = vld [vmem:[%s2168_s5 + $0x300] sm:$0xff] }
 0x1b7   :  { %1475 = vmatprep.subr.bf16.mxu1 %v1474_v3  ;;  %v741_v3 = vld [vmem:[%s2168_s5 + $0x230] sm:$0xff]  ;;  %v1519_v4 = vpack.c.bf16 %v768_v60, %v767_v58 }
 0x1ba   :  { %1477 = vmatpush3.bf16.msra.mxu1 %v1476_v8  ;;  %v742_v8 = vld [vmem:[%s2168_s5 + $0x238] sm:$0xff] }
 0x1bb   :  { %1479 = vmatprep.subr.bf16.mxu1 %v1478_v11  ;;  %v759_v11 = vld [vmem:[%s2168_s5 + $0x2c0] sm:$0xff]  ;;  %v1500_v14 = vpack.c.bf16 %v742_v8, %v741_v3 }
 0x1bc   :  { %v1502_v17 = vpack.c.bf16 %v760_v12, %v759_v11 }
 0x1be   :  { %1481 = vmatpush3.bf16.msra.mxu1 %v1480_v16 }
 0x1bf   :  { %1483 = vmatprep.subr.bf16.mxu1 %v1482_v19  ;;  %v743_v19 = vld [vmem:[%s2168_s5 + $0x240] sm:$0xff] }
 0x1c0   :  { %v1504_v28 = vpack.c.bf16 %v744_v20, %v743_v19 }
 0x1c2   :  { %1485 = vmatpush3.bf16.msra.mxu1 %v1484_v22  ;;  %v761_v22 = vld [vmem:[%s2168_s5 + $0x2d0] sm:$0xff] }
 0x1c3   :  { %1518 = vmatprep.subr.bf16.mxu1 %v1577_v25 }
 0x260   :  { %v447_v31 = vpop.f32.mrb[0].mxu1 }
 0x261   :  { %v448_v32 = vadd.f32 %v447_v31, %v345_v29  ;;  %v449_v33 = vpop.f32.mrb[1].mxu1  ;;  %v369_v29 = vrot.slane %v2017_v27, %v368_v18  ;;  %v746_v31 = vld [vmem:[%s2168_s5 + $0x258] sm:$0xff] }
 0x262   :  { %v450_v37 = vadd.f32 %v449_v33, %v349_v30  ;;  %v745_v30 = vld [vmem:[%s2168_s5 + $0x250] sm:$0xff]  ;;  %v764_v33 = vld [vmem:[%s2168_s5 + $0x2e8] sm:$0xff] }
 0x263   :  { %v664_v43 = vmax.f32 %v448_v32, 0.0  ;;  %v763_v32 = vld [vmem:[%s2168_s5 + $0x2e0] sm:$0xff]  ;;  %v1508_v35 = vpack.c.bf16 %v746_v31, %v745_v30 }
 0x264   :  { %v665_v41 = vmax.f32 %v450_v37, 0.0  ;;  %v1510_v39 = vpack.c.bf16 %v764_v33, %v763_v32 }
 0x266   :  { %845 = vmatprep.mubr.f32.mxu0 %v665_v41  ;;  %v748_v41 = vld [vmem:[%s2168_s5 + $0x268] sm:$0xff] }
 0x267   :  { %846 = vmatmul.mubr.f32.vlgmr.msra.gmra.mrb[8].mxu0 %v664_v43 }
 0x268   :  { %v518_v51 = vpop.f32.mrb[2].mxu1  ;;  %1489 = vmatpush3.bf16.msra.mxu0 %v1488_v42  ;;  %v765_v42 = vld [vmem:[%s2168_s5 + $0x2f0] sm:$0xff] }
 0x269   :  { %v519_v54 = vadd.f32 %v518_v51, %v353_v44  ;;  %v520_v55 = vpop.f32.mrb[3].mxu1  ;;  %1491 = vmatprep.subr.bf16.mxu0 %v1490_v45  ;;  %v1512_v44 = vpack.c.bf16 %v748_v41, %v747_v40  ;;  %v361_v45 = vrot.slane %v2017_v27, %v360_v36  ;;  %v1514_v46 = vpack.c.bf16 %v766_v24, %v765_v42  ;;  %v1062_v51 = vld [vmem:[%s2170_s7] sm:$0xff] }
 0x26a   :  { %v521_v61 = vadd.f32 %v520_v55, %v357_v48  ;;  %v750_v48 = vld [vmem:[%s2168_s5 + $0x278] sm:$0xff]  ;;  %v1172_v55 = vld [vmem:[%s2169_s6] ss:$0 sm:$0xff]  ;;  %s1579_s6 = smov [#allocation2]  }
 0x26b   :  { %v666_v5 = vmax.f32 %v519_v54, 0.0  ;;  %v1516_v49 = vpack.c.bf16 %v750_v48, %v749_v47  ;;  %s1150_s17 = sshll.u32 %s1579_s6, 4  ;;  %s1151_s17 = int_to_ptr.vmem [resolvable:$true] %s1150_s17 }
 0x26c   :  { %v667_v1 = vmax.f32 %v521_v61, 0.0  ;;  %1493 = vmatpush3.bf16.msra.mxu0 %v1492_v52  ;;  %s1548_s18 = scalar_lea.vmem %s1151_s17, 32  ;;  %p1553_p1 = scmp.lt.s32.totalorder %s1151_s17, %s1151_s17 }
 0x26d   :  { %1495 = vmatprep.subr.bf16.mxu0 %v1494_v56  ;;  %p1549_p0 = scmp.ne.s32.totalorder %s1151_s17, %s1548_s18  ;;  %p1554_p2 = scmp.lt.s32.totalorder %s1548_s18, %s1548_s18 }
 0x26e   :  { %915 = vmatprep.mubr.f32.mxu1 %v667_v1 }
 0x26f   :  { %916 = vmatmul.mubr.f32.vlgmr.msra.gmra.mrb[8].mxu1 %v666_v5  ;;  %v1174_v5 = vld [vmem:[%s2171_s8] ss:$0 sm:$0xff]  ;;  %p1555_p3 = por %p1554_p2, %p1553_p1 }
 0x270   :  { %v589_v13 = vpop.f32.mrb[4].mxu1  ;;  %1497 = vmatpush3.bf16.msra.mxu0 %v1496_v2  ;;  %1520 = vmatpush3.bf16.msra.mxu1 %v1519_v4 }
 0x271   :  { %v591_v16 = vpop.f32.mrb[5].mxu1  ;;  %1499 = vmatprep.subr.bf16.mxu0 %v1498_v7  ;;  %1521 = vmatprep.subr.bf16.mxu1 %v1577_v25  ;;  %v1506_v25 = vpack.c.bf16 %v762_v23, %v761_v22  ;;  %v590_v50 = vadd.f32 %v589_v13, %v361_v45  ;;  %p1556_p4 = pnand %p1555_p3, %p1549_p0 }
 0x272   :  { %v592_v21 = vadd.f32 %v591_v16, %v365_v6  ;;  %1362 = vmatprep.mubr.msk.f32.mxu1 %vm1578_vm0, %v1573_v59 }
 0x273   :  { %v668_v27 = vmax.f32 %v590_v50, 0.0 }
 0x274   :  { %v669_v26 = vmax.f32 %v592_v21, 0.0  ;;  %1501 = vmatpush3.bf16.msra.mxu0 %v1500_v14  ;;  %1523 = vmatpush3.bf16.msra.mxu1 %v1522_v15 }
 0x275   :  { %1503 = vmatprep.subr.bf16.mxu0 %v1502_v17  ;;  %1365 = vmatprep.subr.mxu1 %v1573_v59 }
 0x276   :  { %985 = vmatprep.mubr.f32.mxu0 %v669_v26 }
 0x278   :  { %v660_v34 = vpop.f32.mrb[6].mxu1  ;;  %1505 = vmatpush3.bf16.msra.mxu0 %v1504_v28 }
 0x279   :  { %v661_v37 = vadd.f32 %v660_v34, %v369_v29  ;;  %v1353_v38 = vpop.f32.mrb[7].mxu1  ;;  %1507 = vmatprep.subr.bf16.mxu0 %v1506_v25 }
 0x27b   :  { %v670_v43 = vmax.f32 %v661_v37, 0.0 }
 0x27c   :  { %1509 = vmatpush3.bf16.msra.mxu0 %v1508_v35 }
 0x27d   :  { %1363 = vmatmul.mubr.msk.f32.vlgmr.msra.gmra.mrb[10].mxu1 %vm377_vm15, %v670_v43  ;;  %1511 = vmatprep.subr.bf16.mxu0 %v1510_v39 }
 0x27e   :  { %1367 = vmatprep.mubr.msk.f32.mxu1 %vm1578_vm0, %v1573_v59  ;;  %1366 = vmatpush3.msra.mxu1 %v1062_v51 }
 0x280   :  { %1513 = vmatpush3.bf16.msra.mxu0 %v1512_v44 }
 0x281   :  { %1515 = vmatprep.subr.bf16.mxu0 %v1514_v46 }
 0x284   :  { %1517 = vmatpush3.bf16.msra.mxu0 %v1516_v49 }
 0x287   :  { %986 = vmatmul.mubr.f32.vlgmr.msra.gmra.mrb[10].mxu0 %v668_v27 }
 0x33a   :  { %v1231_v52 = vpop.f32.mrb[8].mxu0 }
 0x33b   :  { %v1232_v53 = vpop.f32.mrb[9].mxu0 }
 0x33c   :  { %v1233_v54 = vadd.f32 %v1232_v53, %v1231_v52 }
 0x33e   :  { %v848_v57 = vadd.f32 %v1233_v54, %v1172_v55 }
 0x342   :  { %v1266_v59 = vpop.f32.mrb[8].mxu1 }
 0x343   :  { %v1267_v56 = vpop.f32.mrb[9].mxu1 }
 0x344   :  { %v1268_v58 = vadd.f32 %v1267_v56, %v1266_v59 }
 0x346   :  { %v918_v60 = vadd.f32 %v1268_v58, %v848_v57 }
 0x350   :  { %v1057_v61 = vpop.f32.mrb[10].mxu1 }
 0x351   :  { %v1364_v62 = vpop.f32.mrb[11].mxu1 }
 0x35a   :  { %v1301_v63 = vpop.f32.mrb[10].mxu0 }
 0x35b   :  { %v1302_v0 = vpop.f32.mrb[11].mxu0 }
 0x35c   :  { %v1303_v1 = vadd.f32 %v1302_v0, %v1301_v63 }
 0x35e   :  { %v988_v2 = vadd.f32 %v1303_v1, %v918_v60 }
 0x360   :  { %v1058_v3 = vadd.f32 %v1057_v61, %v988_v2 }
 0x362   :  { %v1061_v4 = vmax.f32 %v1058_v3, 0.0 }
 0x364   :  { %1368 = vmatmul.mubr.msk.f32.vlgmr.msra.gmra.mrb[12].mxu1 %vm306_vm12, %v1061_v4 }
 0x437   :  { %v1139_v7 = vpop.f32.mrb[12].mxu1 }
 0x438   :  { %v1140_v8 = vadd.f32 %v1174_v5, %v1139_v7  ;;  %v1369_v9 = vpop.f32.mrb[13].mxu1 }
 0x43a   :  { %1143 = vst [vmem:[#allocation2] sm:$0x3] %v1140_v8 }
 0x43b   :  { %1559 = shalt.err (!%p1556_p4)
}
 0x43c   :  { %s1560_s21 = scalar_lea.hbm %s2172_s9, 32 }
 0x43d   :  { %p1561_p5 = scmp.ne.s32.totalorder %s2172_s9, %s1560_s21  ;;  %p1564_p6 = scmp.lt.u32.totalorder %s1560_s21, %s2172_s9 }
 0x43f   :  { %p1566_p7 = pnand %p1564_p6, %p1561_p5 }
 0x441   :  { %1569 = shalt.err (!%p1566_p7)
}
 0x442   :  { %1153 = dma.vmem_to_hbm [thread:$0]  %s1151_s17, 32, %s2172_s9, [#allocation3]  }
 0x443   :  { %1570 = dma.done.wait [#allocation3], 32  }
 0x444   :  { %1571 = vsyncadd [#allocation3], 4294967264 }
 0x445   :  { %1157 = vsyncpa [#allocation3], 1 }

</bundles_post_ra>
